<compile_context>
chip_gen: v6e
topology: v6e:2x2x1
jax: 0.10.0
libtpu: 0.0.40
codegen_flags: <defaults>
</compile_context>

<pallas_src>
import functools
from typing import NamedTuple

import jax
import jax.numpy as jnp
from jax.experimental import pallas as pl
from jax.experimental.pallas import tpu as pltpu


def _round_up(v, m):
    return (v + m - 1) // m * m


def _tpu_vmem_and_cores():
    """Returns (per-TensorCore VMEM bytes, TensorCores per chip); safe fallbacks."""
    vmem_cap = 64 << 20          # conservative default = v7x per-TC VMEM
    try:
        info = pltpu.get_tpu_info()
        for name in ("vmem_capacity_bytes", "vmem_size_bytes", "vmem_bytes"):
            val = getattr(info, name, None)
            if val:
                vmem_cap = int(val)
                break
    except Exception:
        info = None
    cores = None
    try:
        if info is not None:
            for name in ("num_tensorcores", "num_cores", "tensorcore_count", "core_count"):
                val = getattr(info, name, None)
                if val:
                    cores = int(val)
                    break
    except Exception:
        cores = None
    if cores is None:
        # Heuristic: 64 MiB/TC parts (v7x) have 2 TCs/chip; 128 MiB parts have 1.
        cores = 2 if vmem_cap <= (64 << 20) else 1
    return vmem_cap, cores


class NormalizedLinearParams(NamedTuple):
    w_op: jax.Array        # (K_pad, N_pad), operand dtype, zero-padded
    b2d: jax.Array         # (1, N_pad), float32
    out_features: int      # original N
    in_features: int       # original K
    block_k: int           # K tile chosen at prepare time (K_pad % block_k == 0)


# ---------------------------------------------------------------------------
# Kernels
# ---------------------------------------------------------------------------

def _epilogue_store(vec, o_ref, beta, out_features):
    """vec: (tm, N_pad) f32 with padded cols == 0. Per-row L1-norm clamp + store."""
    norms = jnp.sum(jnp.abs(vec), axis=-1, keepdims=True)       # (tm, 1)
    thresh = float(beta) * float(out_features)
    # EUP approximate reciprocal + one Newton step (~f32-exact, off the VALU).
    safe = jnp.maximum(norms, 1e-30)
    inv = pl.reciprocal(safe, approx=True)
    inv = inv * (2.0 - safe * inv)
    scale = jnp.where(norms > thresh, thresh * inv, 1.0)        # (tm, 1)
    o_ref[...] = (vec * scale).astype(o_ref.dtype)


def _nl_kernel_single_k(x_ref, w_ref, b_ref, o_ref, *, beta, out_features):
    # Whole-K-resident weight: one MXU matmul, no accumulator scratch.
    vec = jnp.dot(x_ref[...], w_ref[...],
                  preferred_element_type=jnp.float32) + b_ref[...]
    _epilogue_store(vec, o_ref, beta, out_features)


def _nl_kernel_multi_k(x_ref, w_ref, b_ref, o_ref, acc_ref, *, beta, out_features):
    k = pl.program_id(1)

    @pl.when(k == 0)
    def _init():
        # Fold the bias into the accumulator init (saves a (tm, N_pad) add +
        # the large f32 temporary in the epilogue).
        acc_ref[...] = jnp.broadcast_to(b_ref[...], acc_ref.shape)

    acc_ref[...] += jnp.dot(x_ref[...], w_ref[...],
                            preferred_element_type=jnp.float32)

    @pl.when(k == pl.num_programs(1) - 1)
    def _fin():
        _epilogue_store(acc_ref[...], o_ref, beta, out_features)


# ---------------------------------------------------------------------------
# Parameter preparation (cold path, done once)
# ---------------------------------------------------------------------------

def prepare_normalized_linear_params(weight, bias, *, operand_dtype=None,
                                     lane_multiple=128):
    """PyTorch-layout weight (N, K), bias (N,) -> weight-stationary kernel params.

    Run ONCE per parameter set. The weight is pre-transposed to (K_pad, N_pad),
    already cast to the MXU operand dtype and zero-padded (N to a lane-dense
    multiple of 128, K to the K-tile chosen here), so the per-call hot path
    never converts or pads the weight in HBM.

    bf16 operands are recommended on ALL generations (v5e's MXU is bf16-native
    as well): pass operand_dtype=jnp.bfloat16 for ~2x MXU throughput and half
    the weight HBM stream, with f32 accumulation / epilogue.
    """
    N, K = weight.shape
    op_dtype = (jnp.dtype(operand_dtype) if operand_dtype is not None
                else jnp.dtype(weight.dtype))
    op_bytes = op_dtype.itemsize
    N_pad = _round_up(N, lane_multiple)

    vmem_cap, _ = _tpu_vmem_and_cores()
    budget = (vmem_cap * 3) // 4
    big_vmem = vmem_cap >= (96 << 20)             # v5e / v6e (128 MiB parts)
    # Whole-K-resident threshold: the (possibly double-buffered) resident weight
    # plus a working set for x / out / acc must fit the budget.
    working_reserve = (24 << 20) if big_vmem else (16 << 20)
    resident_cap = max(0, (budget - working_reserve) // 2)
    # Streamed-weight cap on the double-buffered K tile.
    stream_cap = (48 << 20) if big_vmem else (24 << 20)

    w_bytes = K * N_pad * op_bytes
    if w_bytes <= resident_cap:
        block_k, K_pad = K, K                      # weight fetched from HBM once
    else:
        block_k = max(128, (stream_cap // (2 * N_pad * op_bytes)) // 128 * 128)
        if block_k >= K:
            block_k, K_pad = K, K
        else:
            K_pad = _round_up(K, block_k)

    w_op = jnp.zeros((K_pad, N_pad), op_dtype).at[:K, :N].set(
        weight.T.astype(op_dtype))
    b2d = jnp.zeros((1, N_pad), jnp.float32).at[:, :N].set(
        bias.astype(jnp.float32).reshape(1, N))
    return NormalizedLinearParams(w_op=w_op, b2d=b2d, out_features=N,
                                  in_features=K, block_k=block_k)


# ---------------------------------------------------------------------------
# Hot-path wrapper
# ---------------------------------------------------------------------------

def normalized_linear(x, params: NormalizedLinearParams, *, beta, block_m=None):
    """x: (B, K); params from prepare_normalized_linear_params.

    Returns (B, out_features) in x.dtype.
    """
    B, K = x.shape
    assert K == params.in_features, "x / weight in_features mismatch"
    K_pad, N_pad = params.w_op.shape
    block_k = params.block_k
    assert N_pad % 128 == 0 and params.b2d.shape == (1, N_pad)
    assert K_pad % block_k == 0

    out_dtype = x.dtype
    op_dtype = params.w_op.dtype
    op_bytes = jnp.dtype(op_dtype).itemsize
    out_bytes = jnp.dtype(out_dtype).itemsize
    # Sub-32-bit operands pack 2 rows / sublane -> M tiles must be multiples of 16.
    sub = 16 if op_bytes < 4 else 8

    vmem_cap, num_cores = _tpu_vmem_and_cores()
    budget = (vmem_cap * 3) // 4                  # ~96 MiB v5e/v6e, ~48 MiB v7x
    if block_m is None:
        # Larger M tiles on 128 MiB parts: with streamed bf16 weights the
        # arithmetic intensity is ~tm FLOPs per weight byte (v6e ridge ≈ 650).
        block_m = 512 if vmem_cap >= (96 << 20) else 256

    multi_k = (K_pad // block_k) > 1

    # ---- M tiling: as large as the batch / VMEM budget allows. ----
    tm = max(sub, min(_round_up(block_m, sub), _round_up(B, sub)))

    def vmem_est(tm_):
        return (2 * tm_ * block_k * op_bytes        # x, double-buffered
                + 2 * block_k * N_pad * op_bytes    # w, (double-)buffered
                + 2 * N_pad * 4                     # bias
                + 2 * tm_ * N_pad * out_bytes       # out, double-buffered
                + tm_ * N_pad * 4)                  # f32 accumulator / epilogue temp

    while vmem_est(tm) > budget and tm > sub:
        tm = max(sub, ((tm // 2) // sub) * sub)

    B_pad = _round_up(B, tm)
    # Keep >= 2 M grid steps only where it helps: 2-TensorCore chips (v7x).
    if num_cores >= 2 and B_pad // tm == 1 and tm >= 256:
        tm = _round_up(tm // 2, sub)
        B_pad = _round_up(B, tm)

    # Hot path only touches the (small) activations: cast + pad x if needed.
    x_op = x.astype(op_dtype)
    if B_pad != B or K_pad != K:
        x_op = jnp.pad(x_op, ((0, B_pad - B), (0, K_pad - K)))

    vmem_limit = int(min(vmem_cap - (8 << 20),
                         max(32 << 20, vmem_est(tm) + (8 << 20))))

    if not multi_k:
        grid = (B_pad // tm,)
        kernel = functools.partial(_nl_kernel_single_k,
                                   beta=float(beta),
                                   out_features=int(params.out_features))
        in_specs = [
            pl.BlockSpec((tm, K_pad), lambda i: (i, 0)),
            pl.BlockSpec((K_pad, N_pad), lambda i: (0, 0)),   # resident weight
            pl.BlockSpec((1, N_pad), lambda i: (0, 0)),
        ]
        out_specs = pl.BlockSpec((tm, N_pad), lambda i: (i, 0))
        scratch_shapes = []
        dim_sem = ("parallel",)
    else:
        grid = (B_pad // tm, K_pad // block_k)
        kernel = functools.partial(_nl_kernel_multi_k,
                                   beta=float(beta),
                                   out_features=int(params.out_features))
        # Triple-buffer the streamed weight on 128 MiB parts when it fits.
        w_spec_kwargs = {}
        if vmem_cap >= (96 << 20) and \
                vmem_est(tm) + block_k * N_pad * op_bytes <= budget:
            w_spec_kwargs["pipeline_mode"] = pl.Buffered(3)
        in_specs = [
            pl.BlockSpec((tm, block_k), lambda i, k: (i, k)),
            pl.BlockSpec((block_k, N_pad), lambda i, k: (k, 0), **w_spec_kwargs),
            pl.BlockSpec((1, N_pad), lambda i, k: (0, 0)),
        ]
        out_specs = pl.BlockSpec((tm, N_pad), lambda i, k: (i, 0))
        scratch_shapes = [pltpu.VMEM((tm, N_pad), jnp.float32)]
        dim_sem = ("parallel", "arbitrary")

    out = pl.pallas_call(
        kernel,
        out_shape=jax.ShapeDtypeStruct((B_pad, N_pad), out_dtype),
        grid_spec=pltpu.PrefetchScalarGridSpec(
            num_scalar_prefetch=0,
            grid=grid,
            in_specs=in_specs,
            out_specs=out_specs,
            scratch_shapes=scratch_shapes,
        ),
        compiler_params=pltpu.CompilerParams(
            dimension_semantics=dim_sem,
            vmem_limit_bytes=vmem_limit,
        ),
    )(x_op, params.w_op, params.b2d)

    return out[:B, :params.out_features]


# ---------------------------------------------------------------------------
# Reference + test
# ---------------------------------------------------------------------------

def _xavier_uniform(key, shape, gain):
    # shape = (out_features, in_features); fan_in = shape[1], fan_out = shape[0]
    fan_in, fan_out = shape[1], shape[0]
    bound = gain * (6.0 / (fan_in + fan_out)) ** 0.5
    return jax.random.uniform(key, shape, jnp.float32, -bound, bound)


def _reference(x, weight, bias, beta):
    vec = x @ weight.T + bias
    norms = jnp.sum(jnp.abs(vec), axis=-1, keepdims=True)
    n = weight.shape[0]
    normalized = vec * n * beta / norms
    return jnp.where(norms / n > beta, normalized, vec)


if __name__ == "__main__":
    key = jax.random.PRNGKey(0)
    k_x, k_w, k_b = jax.random.split(key, 3)

    batch, in_features, out_features = 16, 32, 64
    beta = 1.0

    # Deterministic init: xavier_uniform with tanh gain (5/3); Linear-style bias.
    tanh_gain = 5.0 / 3.0
    weight = _xavier_uniform(k_w, (out_features, in_features), tanh_gain)
    bias = jax.random.uniform(
        k_b, (out_features,), jnp.float32,
        -1.0 / in_features ** 0.5, 1.0 / in_features ** 0.5,
    )
    x = jax.random.normal(k_x, (batch, in_features), jnp.float32)

    ref = _reference(x, weight, bias, beta)

    # f32-operand path (weight prepared once: pre-transposed, lane-padded, op dtype).
    params_f32 = prepare_normalized_linear_params(weight, bias)
    out = normalized_linear(x, params_f32, beta=beta)
    out = jax.block_until_ready(out)
    assert out.shape == (batch, out_features)
    assert jnp.allclose(out, ref, atol=1e-4, rtol=1e-4), "f32 mismatch vs reference"

    # bf16-operand path (recommended on all generations), f32 accumulate + epilogue.
    params_bf16 = prepare_normalized_linear_params(weight, bias,
                                                   operand_dtype=jnp.bfloat16)
    out_bf16 = normalized_linear(x, params_bf16, beta=beta)
    out_bf16 = jax.block_until_ready(out_bf16)
    assert out_bf16.shape == (batch, out_features)
    assert jnp.allclose(out_bf16, ref, atol=5e-2, rtol=5e-2), "bf16 mismatch vs reference"

    print("KERNEL_OK")
</pallas_src>

<mosaic_0001>
module attributes {stable_mosaic.version = 11 : i64} {
  func.func @_nl_kernel_single_k(%arg0: i32, %arg1: memref<16x32xf32, #tpu.memory_space<vmem>>, %arg2: memref<32x128xf32, #tpu.memory_space<vmem>>, %arg3: memref<1x128xf32, #tpu.memory_space<vmem>>, %arg4: memref<16x128xf32, #tpu.memory_space<vmem>>) attributes {dimension_semantics = [#tpu.dimension_semantics<parallel>], iteration_bounds = array<i64: 1>, scalar_prefetch = 0 : i64, scratch_operands = 0 : i64, tpu.core_type = #tpu.core_type<tc>, window_params = [{transform_indices = @transform_0, window_bounds = array<i64: 16, 32>}, {pipeline_mode = #tpu.pipeline_mode<synchronous>, transform_indices = @transform_1, window_bounds = array<i64: 32, 128>}, {pipeline_mode = #tpu.pipeline_mode<synchronous>, transform_indices = @transform_2, window_bounds = array<i64: 1, 128>}, {transform_indices = @transform_3, window_bounds = array<i64: 16, 128>}]} {
    %c0 = arith.constant 0 : index
    %c0_0 = arith.constant 0 : index
    %0 = vector.load %arg1[%c0, %c0_0] : memref<16x32xf32, #tpu.memory_space<vmem>>, vector<16x32xf32>
    %c0_1 = arith.constant 0 : index
    %c0_2 = arith.constant 0 : index
    %1 = vector.load %arg2[%c0_1, %c0_2] : memref<32x128xf32, #tpu.memory_space<vmem>>, vector<32x128xf32>
    %cst = arith.constant dense<0.000000e+00> : vector<16x128xf32>
    %2 = tpu.matmul %0, %1, %cst {dimension_numbers = #tpu.dot_dimension_numbers<[1], [0], [0], [1], [0, 0, 1, 1], [], []>} : vector<16x32xf32>, vector<32x128xf32>, vector<16x128xf32> -> vector<16x128xf32>
    %c0_3 = arith.constant 0 : index
    %c0_4 = arith.constant 0 : index
    %3 = vector.load %arg3[%c0_3, %c0_4] : memref<1x128xf32, #tpu.memory_space<vmem>>, vector<1x128xf32>
    %4 = vector.broadcast %3 : vector<1x128xf32> to vector<16x128xf32>
    %5 = arith.addf %2, %4 : vector<16x128xf32>
    %6 = math.absf %5 : vector<16x128xf32>
    %cst_5 = arith.constant dense<0.000000e+00> : vector<16xf32>
    %7 = vector.multi_reduction <add>, %6, %cst_5 [1] : vector<16x128xf32> to vector<16xf32>
    %8 = vector.shape_cast %7 : vector<16xf32> to vector<16x1xf32>
    %cst_6 = arith.constant 1.000000e-30 : f32
    %9 = vector.broadcast %cst_6 : f32 to vector<16x1xf32>
    %10 = arith.maximumf %8, %9 : vector<16x1xf32>
    %11 = tpu.reciprocal %10 {approx = true} : vector<16x1xf32> -> vector<16x1xf32>
    %12 = arith.mulf %10, %11 : vector<16x1xf32>
    %cst_7 = arith.constant 2.000000e+00 : f32
    %13 = vector.broadcast %cst_7 : f32 to vector<16x1xf32>
    %14 = arith.subf %13, %12 : vector<16x1xf32>
    %15 = arith.mulf %11, %14 : vector<16x1xf32>
    %cst_8 = arith.constant 6.400000e+01 : f32
    %16 = vector.broadcast %cst_8 : f32 to vector<16x1xf32>
    %17 = arith.cmpf ogt, %8, %16 : vector<16x1xf32>
    %cst_9 = arith.constant 6.400000e+01 : f32
    %18 = vector.broadcast %cst_9 : f32 to vector<16x1xf32>
    %19 = arith.mulf %18, %15 : vector<16x1xf32>
    %cst_10 = arith.constant 1.000000e+00 : f32
    %20 = vector.broadcast %cst_10 : f32 to vector<16x1xf32>
    %21 = arith.select %17, %19, %20 : vector<16x1xi1>, vector<16x1xf32>
    %22 = vector.broadcast %21 : vector<16x1xf32> to vector<16x128xf32>
    %23 = arith.mulf %5, %22 : vector<16x128xf32>
    %c0_11 = arith.constant 0 : index
    %c0_12 = arith.constant 0 : index
    %24 = vector.load %arg4[%c0_11, %c0_12] : memref<16x128xf32, #tpu.memory_space<vmem>>, vector<16x128xf32>
    tpu.vector_store %arg4[%c0_11, %c0_12], %23 {strides = array<i32>} : memref<16x128xf32, #tpu.memory_space<vmem>>, vector<16x128xf32>,
    return
  }
  func.func @transform_0(%arg0: i32) -> (i32, i32) {
    %c0_i32 = arith.constant 0 : i32
    %c0_i32_0 = arith.constant 0 : i32
    return %arg0, %c0_i32 : i32, i32
  }
  func.func @transform_1(%arg0: i32) -> (i32, i32) {
    %c0_i32 = arith.constant 0 : i32
    %c0_i32_0 = arith.constant 0 : i32
    %c0_i32_1 = arith.constant 0 : i32
    return %c0_i32, %c0_i32_0 : i32, i32
  }
  func.func @transform_2(%arg0: i32) -> (i32, i32) {
    %c0_i32 = arith.constant 0 : i32
    %c0_i32_0 = arith.constant 0 : i32
    %c0_i32_1 = arith.constant 0 : i32
    return %c0_i32, %c0_i32_0 : i32, i32
  }
  func.func @transform_3(%arg0: i32) -> (i32, i32) {
    %c0_i32 = arith.constant 0 : i32
    %c0_i32_0 = arith.constant 0 : i32
    return %arg0, %c0_i32 : i32, i32
  }
}

</mosaic_0001>

<bundles_post_ra>
// kernel: tpu_custom_call.1
= control target key start
LH: loop header
LB: loop body
LE: loop exit
PB: predicated region body
PF: predicated region fallthrough
CT: control target
= control target key end

     0   :  { %8 = vsyncpa [#allocation3], 0  ;;  %s325_s0 = inlined_call_operand.hbm [shape: f32[16,32], index: 0, kind: input, shape index: {}]   ;;  %s326_s1 = inlined_call_operand.hbm [shape: f32[32,128], index: 1, kind: input, shape index: {}]   ;;  %s327_s2 = inlined_call_operand.vmem [shape: f32[1,128], index: 2, kind: input, shape index: {}]   ;;  %s328_s3 = inlined_call_operand.hbm [shape: f32[16,128], index: 3, kind: output, shape index: {}]  }
   0x1   :  { %9 = vsyncpa [#allocation6], 0 }
   0x2   :  { %10 = vsyncpa [#allocation4], 0  ;;  %s277_s12 = smov [#allocation2]  }
   0x3   :  { %s16_s13 = sshll.u32 %s277_s12, 4  ;;  %s17_s13 = int_to_ptr.vmem [resolvable:$true] %s16_s13 }
   0x4   :  { %s219_s14 = scalar_lea.vmem %s17_s13, 256  ;;  %p224_p1 = scmp.lt.s32.totalorder %s17_s13, %s17_s13 }
   0x5   :  { %p220_p0 = scmp.ne.s32.totalorder %s17_s13, %s219_s14  ;;  %p225_p2 = scmp.lt.s32.totalorder %s219_s14, %s219_s14 }
   0x7   :  { %p226_p3 = por %p225_p2, %p224_p1 }
   0x9   :  { %p227_p4 = pnand %p226_p3, %p220_p0 }
   0xb   :  { %230 = shalt.err (!%p227_p4)
}
   0xc   :  { %s278_s15 = smov 128   ;;  %s279_s16 = smov 8  }
   0xd   :  { %22 = dma.hbm_to_vmem [thread:$0]  %s325_s0, 256, %s17_s13, [#allocation3], %s278_s15, %s278_s15, %s279_s16  }
   0xe   :  { %s280_s19 = smov [#allocation5]  }
   0xf   :  { %s28_s20 = sshll.u32 %s280_s19, 4  ;;  %s29_s20 = int_to_ptr.vmem [resolvable:$true] %s28_s20 }
  0x10   :  { %s239_s21 = scalar_lea.vmem %s29_s20, 512  ;;  %p244_p6 = scmp.lt.s32.totalorder %s29_s20, %s29_s20 }
  0x11   :  { %p240_p5 = scmp.ne.s32.totalorder %s29_s20, %s239_s21  ;;  %p245_p7 = scmp.lt.s32.totalorder %s239_s21, %s239_s21 }
  0x13   :  { %p246_p8 = por %p245_p7, %p244_p6 }
  0x15   :  { %p247_p9 = pnand %p246_p8, %p240_p5 }
  0x17   :  { %250 = shalt.err (!%p247_p9)
}
  0x18   :  { %34 = dma.hbm_to_vmem [thread:$0]  %s326_s1, 512, %s29_s20, [#allocation6], %s278_s15, %s278_s15, %s279_s16  }
  0x19   :  { %271 = dma.done.wait [#allocation3], 256  }
  0x1a   :  { %272 = vsyncadd [#allocation3], 4294967040 }
  0x1b   :  { %273 = dma.done.wait [#allocation6], 512  }
  0x1c   :  { %274 = vsyncadd [#allocation6], 4294966784  ;;  %vm56_vm0 = vcmask 261120   ;;  %v48_v0 = vld [vmem:[#allocation5 + $0x18] sm:$0xff]  ;;  %v47_v1 = vld [vmem:[#allocation5 + $0x10] sm:$0xff] }
  0x1d   :  { %191 = vmatprep.subr.mxu0 %v48_v0  ;;  %v43_v2 = vld [vmem:[#allocation2] sm:$0xff]  ;;  %v46_v3 = vld [vmem:[#allocation5 + $0x8] sm:$0xff]  ;;  %v45_v4 = vld [vmem:[#allocation5] sm:$0xff] }
  0x1e   :  { %192 = vmatpush3.msra.mxu0 %v48_v0  ;;  %199 = vmatprep.mubr.msk.f32.mxu0 %vm56_vm0, %v43_v2  ;;  %v44_v5 = vld [vmem:[#allocation2 + $0x8] sm:$0xff]  ;;  %v182_v7 = vld [vmem:[%s327_s2] ss:$0 sm:$0xff]  ;;  %s281_s2 = smov [#allocation7]  }
  0x1f   :  { %193 = vmatprep.subr.mxu0 %v47_v1  ;;  %s169_s24 = sshll.u32 %s281_s2, 4  ;;  %s170_s24 = int_to_ptr.vmem [resolvable:$true] %s169_s24 }
  0x20   :  { %194 = vmatpush3.msra.mxu0 %v47_v1  ;;  %s251_s25 = scalar_lea.vmem %s170_s24, 256  ;;  %p256_p11 = scmp.lt.s32.totalorder %s170_s24, %s170_s24 }
  0x21   :  { %195 = vmatprep.subr.mxu0 %v46_v3  ;;  %p252_p10 = scmp.ne.s32.totalorder %s170_s24, %s251_s25  ;;  %p257_p12 = scmp.lt.s32.totalorder %s251_s25, %s251_s25 }
  0x22   :  { %196 = vmatpush3.msra.mxu0 %v46_v3 }
  0x23   :  { %197 = vmatprep.subr.mxu0 %v45_v4  ;;  %p258_p13 = por %p257_p12, %p256_p11 }
  0x24   :  { %198 = vmatpush3.msra.mxu0 %v45_v4 }
  0x25   :  { %200 = vmatmul.mubr.msk.f32.vlgmr.msra.gmra.mxu0 %vm56_vm0, %v44_v5  ;;  %p259_p0 = pnand %p258_p13, %p252_p10 }
  0xe5   :  { %v201_v6 = vpop.f32.mrf.mxu0 }
  0xe6   :  { %v135_v10 = vadd.f32 %v201_v6, %v182_v7 }
  0xe7   :  { %v129_v8 = vpop.f32.mrf.mxu0 }
  0xe8   :  { %v130_v9 = vadd.f32 %v182_v7, %v129_v8  ;;  %v139_v12 = vand.u32 2147483647, %v135_v10 }
  0xea   :  { %v138_v11 = vand.u32 2147483647, %v130_v9 }
  0xec   :  { %140 = vadd.xlane.f32.xlu0 %v138_v11 }
  0xf0   :  { %142 = vadd.xlane.f32.xlu0 %v139_v12 }
 0x175   :  { %v141_v13 = vpop.xlane.xlu0 %140 }
 0x176   :  { %v144_v14 = vmax.f32 %v141_v13, 1e-30  ;;  %vm154_vm1 = vcmp.gt.f32.partialorder %v141_v13, 64.0 }
 0x178   :  { %207 = vrcp.f32 %v144_v14 }
 0x179   :  { %v143_v15 = vpop.xlane.xlu0 %142 }
 0x17a   :  { %v145_v16 = vmax.f32 %v143_v15, 1e-30  ;;  %vm155_vm2 = vcmp.gt.f32.partialorder %v143_v15, 64.0 }
 0x17c   :  { %209 = vrcp.f32 %v145_v16 }
 0x185   :  { %v208_v17 = vpop.eup %207 }
 0x186   :  { %v148_v18 = vmul.f32 %v208_v17, %v144_v14 }
 0x188   :  { %v150_v19 = vsub.f32 2.0, %v148_v18 }
 0x189   :  { %v210_v20 = vpop.eup %209 }
 0x18a   :  { %v152_v21 = vmul.f32 %v208_v17, %v150_v19  ;;  %v149_v22 = vmul.f32 %v210_v20, %v145_v16 }
 0x18c   :  { %v156_v23 = vmul.f32 64.0, %v152_v21  ;;  %v151_v24 = vsub.f32 2.0, %v149_v22 }
 0x18e   :  { %v158_v25 = vsel %vm154_vm1, %v156_v23, 1.0  ;;  %v153_v26 = vmul.f32 %v210_v20, %v151_v24 }
 0x18f   :  { %v160_v27 = vmul.f32 %v158_v25, %v130_v9 }
 0x190   :  { %v157_v28 = vmul.f32 64.0, %v153_v26 }
 0x191   :  { %162 = vst [vmem:[#allocation7] sm:$0xff] %v160_v27 }
 0x192   :  { %v159_v29 = vsel %vm155_vm2, %v157_v28, 1.0 }
 0x193   :  { %v161_v30 = vmul.f32 %v159_v29, %v135_v10 }
 0x195   :  { %163 = vst [vmem:[#allocation7 + $0x8] sm:$0xff] %v161_v30 }
 0x196   :  { %262 = shalt.err (!%p259_p0)
}
 0x197   :  { %175 = dma.vmem_to_hbm [thread:$0]  %s170_s24, 256, %s328_s3, [#allocation4], %s278_s15, %s278_s15, %s279_s16  }
 0x198   :  { %275 = dma.done.wait [#allocation4], 256  }
 0x199   :  { %276 = vsyncadd [#allocation4], 4294967040 }
 0x19a   :  { %179 = vsyncpa [#allocation3], 1 }
 0x19b   :  { %180 = vsyncpa [#allocation6], 1 }
 0x19c   :  { %181 = vsyncpa [#allocation4], 1 }

</bundles_post_ra>
